<compile_context>
chip_gen: v6e
topology: v6e:2x2x1
jax: 0.10.0
libtpu: 0.0.40
codegen_flags: <defaults>
</compile_context>

<pallas_src>
import functools

import jax
import jax.numpy as jnp
from jax import lax
from jax.experimental import pallas as pl
from jax.experimental.pallas import tpu as pltpu


_MASK_VALUE = -1e30                    # finite "-inf" (avoids exp(-inf - -inf) NaNs)
_SEQ_TILE_TARGET = 256                 # MXU face on v6e/v7x; multiple of v5e's 128
_VMEM_LIMIT_BYTES = 32 * 1024 * 1024   # explicit scoped-VMEM limit; v7x (64 MiB) safe

# Contract last dim of lhs with last dim of rhs ("NT" matmul) -> no explicit transpose.
_NT = (((1,), (1,)), ((), ()))


def _round_up(n, m):
    return ((n + m - 1) // m) * m


def _seq_tile(seq_len):
    """Sequence tile: a multiple of 8 sublanes, capped at the MXU face."""
    return min(_SEQ_TILE_TARGET, _round_up(seq_len, 8))


def _pad_rows(x3, rows_pad):
    rows = x3.shape[1]
    if rows == rows_pad:
        return x3
    return jnp.pad(x3, ((0, 0), (0, rows_pad - rows), (0, 0)))


# ---------------------------------------------------------------------------
# Kernel 1: fused bias-free projections, emitting a head-major layout.
# ---------------------------------------------------------------------------
def _proj_heads_kernel(x_ref, *rest, n_proj):
    """Grid step (b, row-tile i, head h): y_j[b, h, i*tr:(i+1)*tr, :] = x_tile @ W_j[h]^T."""
    w_refs = rest[:n_proj]
    o_refs = rest[n_proj:]
    x = x_ref[0]                                      # (tr, Din), input dtype (MXU operand)
    for w_ref, o_ref in zip(w_refs, o_refs):
        y = lax.dot_general(x, w_ref[0], _NT,         # (tr, d), f32 accumulation
                            preferred_element_type=jnp.float32)
        o_ref[0, 0] = y.astype(o_ref.dtype)


def _project_to_heads(x3, weights, *, heads, dim_head, row_tile):
    """x3: (B, S_pad, Din); weights: list of (heads*dim_head, Din).

    Returns one (B, heads, S_pad, dim_head) array per weight: the head split is
    expressed as a BlockSpec index_map so the attention kernel never lane-slices.
    """
    B, S, Din = x3.shape
    n_proj = len(weights)
    w3 = [w.reshape(heads, dim_head, Din) for w in weights]   # contiguous (free) reshape

    in_specs = [pl.BlockSpec((1, row_tile, Din), lambda b, i, h: (b, i, 0))]
    in_specs += [pl.BlockSpec((1, dim_head, Din), lambda b, i, h: (h, 0, 0)) for _ in w3]
    out_specs = [pl.BlockSpec((1, 1, row_tile, dim_head), lambda b, i, h: (b, h, i, 0))
                 for _ in w3]
    out_shape = tuple(jax.ShapeDtypeStruct((B, heads, S, dim_head), x3.dtype) for _ in w3)

    return pl.pallas_call(
        functools.partial(_proj_heads_kernel, n_proj=n_proj),
        out_shape=out_shape,
        grid=(B, S // row_tile, heads),
        in_specs=in_specs,
        out_specs=out_specs,
        compiler_params=pltpu.CompilerParams(
            dimension_semantics=("parallel", "parallel", "parallel"),
            vmem_limit_bytes=_VMEM_LIMIT_BYTES),
    )(x3, *w3)


# ---------------------------------------------------------------------------
# Kernel 2: flash attention with the to_out Linear fused as a heads-reduction.
# ---------------------------------------------------------------------------
def _flash_attn_out_kernel(q_ref, k_ref, v_ref, wo_ref, bo_ref, o_ref,
                           m_ref, l_ref, acc_ref, y_ref, *,
                           scale, kv_len, block_kv, mask_kv):
    """Grid = (batch, q-tile, head, kv-tile); kv innermost, head next.

    Per (b, qi, h): online softmax over kv tiles into m/l/acc scratch.
    Per (b, qi):    f32 y scratch accumulates out_h @ Wo_h^T over heads; the final
                    lane-dense (tq, Dq) block (+bias) is written exactly once.
    """
    h = pl.program_id(2)
    kj = pl.program_id(3)
    last_h = pl.num_programs(2) - 1
    last_kj = pl.num_programs(3) - 1

    @pl.when(jnp.logical_and(h == 0, kj == 0))
    def _():
        y_ref[...] = jnp.zeros_like(y_ref)

    @pl.when(kj == 0)
    def _():
        m_ref[...] = jnp.full(m_ref.shape, _MASK_VALUE, dtype=m_ref.dtype)
        l_ref[...] = jnp.zeros_like(l_ref)
        acc_ref[...] = jnp.zeros_like(acc_ref)

    q = q_ref[0, 0]                                   # (tq, d)   input dtype
    k = k_ref[0, 0]                                   # (tkv, d)
    v = v_ref[0, 0]                                   # (tkv, d)

    # Score tile: MXU operands stay in the input dtype, accumulate in f32.
    s = lax.dot_general(q, k, _NT, preferred_element_type=jnp.float32) * scale
    if mask_kv:                                       # static: only when M was padded
        col = lax.broadcasted_iota(jnp.int32, s.shape, 1) + kj * block_kv
        s = jnp.where(col < kv_len, s, _MASK_VALUE)

    m_prev = m_ref[...]                               # (tq, 1)
    m_new = jnp.maximum(m_prev, jnp.max(s, axis=-1, keepdims=True))
    alpha = jnp.exp(m_prev - m_new)                   # (tq, 1)
    p = jnp.exp(s - m_new)                            # (tq, tkv) f32
    l_ref[...] = alpha * l_ref[...] + jnp.sum(p, axis=-1, keepdims=True)
    acc_ref[...] = alpha * acc_ref[...] + jnp.dot(
        p.astype(v.dtype), v, preferred_element_type=jnp.float32)
    m_ref[...] = m_new

    @pl.when(kj == last_kj)
    def _():
        # Fold 1/l into the small (tq, d) result (EUP approx reciprocal), then add
        # this head's fused to_out contribution: out_h @ Wo_h^T -> (tq, Dq) in f32.
        out_h = acc_ref[...] * pl.reciprocal(l_ref[...], approx=True)
        wo_h = wo_ref[0]                              # (Dq, d)
        y_ref[...] += lax.dot_general(out_h.astype(wo_h.dtype), wo_h, _NT,
                                      preferred_element_type=jnp.float32)

    @pl.when(jnp.logical_and(h == last_h, kj == last_kj))
    def _():
        # Fused to_out bias; Dropout(0.0) == identity.  One lane-dense store.
        o_ref[0] = (y_ref[...] + bo_ref[...].astype(jnp.float32)).astype(o_ref.dtype)


def _flash_attention_out_proj(q4, k4, v4, wo, bo, *, scale, kv_len, tq, tkv, out_dtype):
    """q4: (B, H, N_pad, d); k4/v4: (B, H, M_pad, d); wo: (Dq, H*d); bo: (Dq,)."""
    B, H, n_pad, d = q4.shape
    m_pad = k4.shape[2]
    dq = wo.shape[0]
    # (Dq, H*d) -> per-head (H, Dq, d); tiny one-time weight transpose outside the kernel.
    wo3 = jnp.transpose(wo.reshape(dq, H, d), (1, 0, 2))
    bo2 = bo.reshape(1, dq)

    kernel = functools.partial(
        _flash_attn_out_kernel, scale=scale, kv_len=kv_len, block_kv=tkv,
        mask_kv=(m_pad != kv_len))

    return pl.pallas_call(
        kernel,
        out_shape=jax.ShapeDtypeStruct((B, n_pad, dq), out_dtype),
        grid=(B, n_pad // tq, H, m_pad // tkv),
        in_specs=[
            pl.BlockSpec((1, 1, tq, d), lambda b, i, h, j: (b, h, i, 0)),    # q
            pl.BlockSpec((1, 1, tkv, d), lambda b, i, h, j: (b, h, j, 0)),   # k
            pl.BlockSpec((1, 1, tkv, d), lambda b, i, h, j: (b, h, j, 0)),   # v
            pl.BlockSpec((1, dq, d), lambda b, i, h, j: (h, 0, 0)),          # Wo_h
            pl.BlockSpec((1, dq), lambda b, i, h, j: (0, 0)),                # bo
        ],
        out_specs=pl.BlockSpec((1, tq, dq), lambda b, i, h, j: (b, i, 0)),
        scratch_shapes=[
            pltpu.VMEM((tq, 1), jnp.float32),    # m: running max
            pltpu.VMEM((tq, 1), jnp.float32),    # l: running denominator
            pltpu.VMEM((tq, d), jnp.float32),    # per-head attention accumulator
            pltpu.VMEM((tq, dq), jnp.float32),   # fused to_out accumulator (over heads)
        ],
        compiler_params=pltpu.CompilerParams(
            dimension_semantics=("parallel", "parallel", "arbitrary", "arbitrary"),
            vmem_limit_bytes=_VMEM_LIMIT_BYTES),
    )(q4, k4, v4, wo3, bo2)


# ---------------------------------------------------------------------------
# Forward wrapper
# ---------------------------------------------------------------------------
def cross_attention_forward(x, params, context=None):
    """Pallas implementation of CrossAttention.forward (dropout p=0.0)."""
    wq, wk, wv, wo, bo = (
        params["wq"], params["wk"], params["wv"], params["wo"], params["bo"]
    )
    heads = params["heads"]

    B, N, _ = x.shape
    inner = wq.shape[0]
    assert inner % heads == 0
    d = inner // heads
    scale = float(d) ** (-0.5)

    tq = _seq_tile(N)
    n_pad = _round_up(N, tq)
    x_p = _pad_rows(x, n_pad)

    if context is None:
        # Self-attention: x is read from HBM once; q/k/v projected in one fused call.
        tkv = tq
        kv_len = N
        q4, k4, v4 = _project_to_heads(
            x_p, [wq, wk, wv], heads=heads, dim_head=d, row_tile=tq)
    else:
        kv_len = context.shape[1]
        tkv = _seq_tile(kv_len)
        m_pad = _round_up(kv_len, tkv)
        c_p = _pad_rows(context, m_pad)
        (q4,) = _project_to_heads(x_p, [wq], heads=heads, dim_head=d, row_tile=tq)
        k4, v4 = _project_to_heads(
            c_p, [wk, wv], heads=heads, dim_head=d, row_tile=tkv)

    y = _flash_attention_out_proj(
        q4, k4, v4, wo, bo, scale=scale, kv_len=kv_len, tq=tq, tkv=tkv,
        out_dtype=x.dtype)
    return y if n_pad == N else y[:, :N, :]


# ---------------------------------------------------------------------------
# Pure-JAX reference (for validation only)
# ---------------------------------------------------------------------------
def cross_attention_reference(x, params, context=None):
    wq, wk, wv, wo, bo, heads = (
        params["wq"], params["wk"], params["wv"], params["wo"], params["bo"],
        params["heads"],
    )
    B, N, _ = x.shape
    ctx = x if context is None else context
    M = ctx.shape[1]
    inner = wq.shape[0]
    d = inner // heads
    scale = float(d) ** (-0.5)
    q = (x @ wq.T).reshape(B, N, heads, d).transpose(0, 2, 1, 3)
    k = (ctx @ wk.T).reshape(B, M, heads, d).transpose(0, 2, 1, 3)
    v = (ctx @ wv.T).reshape(B, M, heads, d).transpose(0, 2, 1, 3)
    sim = jnp.einsum("bhid,bhjd->bhij", q, k) * scale
    attn = jax.nn.softmax(sim, axis=-1)
    out = jnp.einsum("bhij,bhjd->bhid", attn, v)
    out = out.transpose(0, 2, 1, 3).reshape(B, N, inner)
    return out @ wo.T + bo


# ---------------------------------------------------------------------------
if __name__ == "__main__":
    # Small shapes consistent with the module:
    #   batch=2, seq=8, query_dim=32, heads=2, dim_head=16 -> inner_dim=32
    B, N, query_dim = 2, 8, 32
    heads, dim_head = 2, 16
    inner_dim = heads * dim_head
    M_ctx = 16  # cross-attention context length

    key = jax.random.PRNGKey(0)
    kx, kc, kq, kk, kv, ko, kb = jax.random.split(key, 7)

    x = jax.random.normal(kx, (B, N, query_dim), dtype=jnp.float32)
    ctx = jax.random.normal(kc, (B, M_ctx, query_dim), dtype=jnp.float32)

    params = {
        "wq": 0.05 * jax.random.normal(kq, (inner_dim, query_dim), dtype=jnp.float32),
        "wk": 0.05 * jax.random.normal(kk, (inner_dim, query_dim), dtype=jnp.float32),
        "wv": 0.05 * jax.random.normal(kv, (inner_dim, query_dim), dtype=jnp.float32),
        "wo": 0.05 * jax.random.normal(ko, (query_dim, inner_dim), dtype=jnp.float32),
        "bo": 0.01 * jax.random.normal(kb, (query_dim,), dtype=jnp.float32),
        "heads": heads,
    }

    # approx reciprocal in the softmax normalization -> allow ~1e-3-level diffs.
    tol = dict(atol=5e-3, rtol=5e-3)

    # 1) Self-attention path (context=None)
    y = jax.block_until_ready(cross_attention_forward(x, params, context=None))
    y_ref = cross_attention_reference(x, params, context=None)
    assert y.shape == (B, N, query_dim)
    assert jnp.allclose(y, y_ref, **tol), "self-attn mismatch vs reference"

    # 2) Cross-attention path (explicit context)
    y2 = jax.block_until_ready(cross_attention_forward(x, params, context=ctx))
    y2_ref = cross_attention_reference(x, params, context=ctx)
    assert y2.shape == (B, N, query_dim)
    assert jnp.allclose(y2, y2_ref, **tol), "cross-attn mismatch vs reference"

    # 3) Unaligned lengths (exercise sequence padding + kv masking): N=5, M=9
    x3 = x[:, :5, :]
    ctx3 = ctx[:, :9, :]
    y3 = jax.block_until_ready(cross_attention_forward(x3, params, context=ctx3))
    y3_ref = cross_attention_reference(x3, params, context=ctx3)
    assert y3.shape == (B, 5, query_dim)
    assert jnp.allclose(y3, y3_ref, **tol), "padded/masked cross-attn mismatch"

    print("KERNEL_OK")
</pallas_src>

<mosaic_0001>
module attributes {stable_mosaic.version = 11 : i64} {
  func.func @_proj_heads_kernel(%arg0: i32, %arg1: i32, %arg2: i32, %arg3: memref<1x8x32xf32, #tpu.memory_space<vmem>>, %arg4: memref<1x16x32xf32, #tpu.memory_space<vmem>>, %arg5: memref<1x16x32xf32, #tpu.memory_space<vmem>>, %arg6: memref<1x16x32xf32, #tpu.memory_space<vmem>>, %arg7: memref<1x1x8x16xf32, #tpu.memory_space<vmem>>, %arg8: memref<1x1x8x16xf32, #tpu.memory_space<vmem>>, %arg9: memref<1x1x8x16xf32, #tpu.memory_space<vmem>>) attributes {dimension_semantics = [#tpu.dimension_semantics<parallel>, #tpu.dimension_semantics<parallel>, #tpu.dimension_semantics<parallel>], iteration_bounds = array<i64: 2, 1, 2>, scalar_prefetch = 0 : i64, scratch_operands = 0 : i64, tpu.core_type = #tpu.core_type<tc>, window_params = [{transform_indices = @transform_0, window_bounds = array<i64: 1, 8, 32>}, {transform_indices = @transform_1, window_bounds = array<i64: 1, 16, 32>}, {transform_indices = @transform_2, window_bounds = array<i64: 1, 16, 32>}, {transform_indices = @transform_3, window_bounds = array<i64: 1, 16, 32>}, {transform_indices = @transform_4, window_bounds = array<i64: 1, 1, 8, 16>}, {transform_indices = @transform_5, window_bounds = array<i64: 1, 1, 8, 16>}, {transform_indices = @transform_6, window_bounds = array<i64: 1, 1, 8, 16>}]} {
    %c0 = arith.constant 0 : index
    %c0_0 = arith.constant 0 : index
    %c0_1 = arith.constant 0 : index
    %0 = vector.load %arg3[%c0, %c0_0, %c0_1] : memref<1x8x32xf32, #tpu.memory_space<vmem>>, vector<1x8x32xf32>
    %1 = vector.shape_cast %0 : vector<1x8x32xf32> to vector<8x32xf32>
    %c0_2 = arith.constant 0 : index
    %c0_3 = arith.constant 0 : index
    %c0_4 = arith.constant 0 : index
    %2 = vector.load %arg4[%c0_2, %c0_3, %c0_4] : memref<1x16x32xf32, #tpu.memory_space<vmem>>, vector<1x16x32xf32>
    %3 = vector.shape_cast %2 : vector<1x16x32xf32> to vector<16x32xf32>
    %cst = arith.constant dense<0.000000e+00> : vector<8x16xf32>
    %4 = tpu.matmul %1, %3, %cst {dimension_numbers = #tpu.dot_dimension_numbers<[1], [1], [0], [0], [0, 0, 1, 0], [], []>} : vector<8x32xf32>, vector<16x32xf32>, vector<8x16xf32> -> vector<8x16xf32>
    %c0_5 = arith.constant 0 : index
    %c0_6 = arith.constant 0 : index
    %c0_7 = arith.constant 0 : index
    %c0_8 = arith.constant 0 : index
    %5 = vector.load %arg7[%c0_5, %c0_6, %c0_7, %c0_8] : memref<1x1x8x16xf32, #tpu.memory_space<vmem>>, vector<1x1x8x16xf32>
    %6 = vector.shape_cast %5 : vector<1x1x8x16xf32> to vector<8x16xf32>
    %7 = vector.shape_cast %4 : vector<8x16xf32> to vector<1x1x8x16xf32>
    tpu.vector_store %arg7[%c0_5, %c0_6, %c0_7, %c0_8], %7 {strides = array<i32>} : memref<1x1x8x16xf32, #tpu.memory_space<vmem>>, vector<1x1x8x16xf32>,
    %c0_9 = arith.constant 0 : index
    %c0_10 = arith.constant 0 : index
    %c0_11 = arith.constant 0 : index
    %8 = vector.load %arg5[%c0_9, %c0_10, %c0_11] : memref<1x16x32xf32, #tpu.memory_space<vmem>>, vector<1x16x32xf32>
    %9 = vector.shape_cast %8 : vector<1x16x32xf32> to vector<16x32xf32>
    %cst_12 = arith.constant dense<0.000000e+00> : vector<8x16xf32>
    %10 = tpu.matmul %1, %9, %cst_12 {dimension_numbers = #tpu.dot_dimension_numbers<[1], [1], [0], [0], [0, 0, 1, 0], [], []>} : vector<8x32xf32>, vector<16x32xf32>, vector<8x16xf32> -> vector<8x16xf32>
    %c0_13 = arith.constant 0 : index
    %c0_14 = arith.constant 0 : index
    %c0_15 = arith.constant 0 : index
    %c0_16 = arith.constant 0 : index
    %11 = vector.load %arg8[%c0_13, %c0_14, %c0_15, %c0_16] : memref<1x1x8x16xf32, #tpu.memory_space<vmem>>, vector<1x1x8x16xf32>
    %12 = vector.shape_cast %11 : vector<1x1x8x16xf32> to vector<8x16xf32>
    %13 = vector.shape_cast %10 : vector<8x16xf32> to vector<1x1x8x16xf32>
    tpu.vector_store %arg8[%c0_13, %c0_14, %c0_15, %c0_16], %13 {strides = array<i32>} : memref<1x1x8x16xf32, #tpu.memory_space<vmem>>, vector<1x1x8x16xf32>,
    %c0_17 = arith.constant 0 : index
    %c0_18 = arith.constant 0 : index
    %c0_19 = arith.constant 0 : index
    %14 = vector.load %arg6[%c0_17, %c0_18, %c0_19] : memref<1x16x32xf32, #tpu.memory_space<vmem>>, vector<1x16x32xf32>
    %15 = vector.shape_cast %14 : vector<1x16x32xf32> to vector<16x32xf32>
    %cst_20 = arith.constant dense<0.000000e+00> : vector<8x16xf32>
    %16 = tpu.matmul %1, %15, %cst_20 {dimension_numbers = #tpu.dot_dimension_numbers<[1], [1], [0], [0], [0, 0, 1, 0], [], []>} : vector<8x32xf32>, vector<16x32xf32>, vector<8x16xf32> -> vector<8x16xf32>
    %c0_21 = arith.constant 0 : index
    %c0_22 = arith.constant 0 : index
    %c0_23 = arith.constant 0 : index
    %c0_24 = arith.constant 0 : index
    %17 = vector.load %arg9[%c0_21, %c0_22, %c0_23, %c0_24] : memref<1x1x8x16xf32, #tpu.memory_space<vmem>>, vector<1x1x8x16xf32>
    %18 = vector.shape_cast %17 : vector<1x1x8x16xf32> to vector<8x16xf32>
    %19 = vector.shape_cast %16 : vector<8x16xf32> to vector<1x1x8x16xf32>
    tpu.vector_store %arg9[%c0_21, %c0_22, %c0_23, %c0_24], %19 {strides = array<i32>} : memref<1x1x8x16xf32, #tpu.memory_space<vmem>>, vector<1x1x8x16xf32>,
    return
  }
  func.func @transform_0(%arg0: i32, %arg1: i32, %arg2: i32) -> (i32, i32, i32) {
    %c0_i32 = arith.constant 0 : i32
    %c0_i32_0 = arith.constant 0 : i32
    return %arg0, %arg1, %c0_i32 : i32, i32, i32
  }
  func.func @transform_1(%arg0: i32, %arg1: i32, %arg2: i32) -> (i32, i32, i32) {
    %c0_i32 = arith.constant 0 : i32
    %c0_i32_0 = arith.constant 0 : i32
    %c0_i32_1 = arith.constant 0 : i32
    return %arg2, %c0_i32, %c0_i32_0 : i32, i32, i32
  }
  func.func @transform_2(%arg0: i32, %arg1: i32, %arg2: i32) -> (i32, i32, i32) {
    %c0_i32 = arith.constant 0 : i32
    %c0_i32_0 = arith.constant 0 : i32
    %c0_i32_1 = arith.constant 0 : i32
    return %arg2, %c0_i32, %c0_i32_0 : i32, i32, i32
  }
  func.func @transform_3(%arg0: i32, %arg1: i32, %arg2: i32) -> (i32, i32, i32) {
    %c0_i32 = arith.constant 0 : i32
    %c0_i32_0 = arith.constant 0 : i32
    %c0_i32_1 = arith.constant 0 : i32
    return %arg2, %c0_i32, %c0_i32_0 : i32, i32, i32
  }
  func.func @transform_4(%arg0: i32, %arg1: i32, %arg2: i32) -> (i32, i32, i32, i32) {
    %c0_i32 = arith.constant 0 : i32
    %c0_i32_0 = arith.constant 0 : i32
    return %arg0, %arg2, %arg1, %c0_i32 : i32, i32, i32, i32
  }
  func.func @transform_5(%arg0: i32, %arg1: i32, %arg2: i32) -> (i32, i32, i32, i32) {
    %c0_i32 = arith.constant 0 : i32
    %c0_i32_0 = arith.constant 0 : i32
    return %arg0, %arg2, %arg1, %c0_i32 : i32, i32, i32, i32
  }
  func.func @transform_6(%arg0: i32, %arg1: i32, %arg2: i32) -> (i32, i32, i32, i32) {
    %c0_i32 = arith.constant 0 : i32
    %c0_i32_0 = arith.constant 0 : i32
    return %arg0, %arg2, %arg1, %c0_i32 : i32, i32, i32, i32
  }
}

</mosaic_0001>

<bundles_post_ra>
// kernel: tpu_custom_call.1
= control target key start
LH: loop header
LB: loop body
LE: loop exit
PB: predicated region body
PF: predicated region fallthrough
CT: control target
= control target key end

     0   :  { %s1989_s0 = inlined_call_operand.hbm [shape: f32[2,8,32], index: 0, kind: input, shape index: {}]   ;;  %s1990_s1 = inlined_call_operand.hbm [shape: f32[2,16,32], index: 1, kind: input, shape index: {}]   ;;  %s1991_s2 = inlined_call_operand.hbm [shape: f32[2,16,32], index: 2, kind: input, shape index: {}]   ;;  %s1992_s3 = inlined_call_operand.hbm [shape: f32[2,16,32], index: 3, kind: input, shape index: {}]   ;;  %s1993_s4 = inlined_call_operand.hbm [shape: f32[2,2,8,16], index: 4, kind: output, shape index: {0}]   ;;  %s1994_s5 = inlined_call_operand.hbm [shape: f32[2,2,8,16], index: 5, kind: output, shape index: {1}]   ;;  %s1995_s6 = inlined_call_operand.hbm [shape: f32[2,2,8,16], index: 6, kind: output, shape index: {2}]  }
   0x1   :  { %2020 = sst [smem:[#allocation34_spill]] %s1990_s1 }
   0x2   :  { %2021 = sst [smem:[#allocation35_spill]] %s1993_s4 }
   0x3   :  { %2022 = sst [smem:[#allocation36_spill]] %s1994_s5 }
   0x4   :  { %2023 = sst [smem:[#allocation37_spill]] %s1995_s6 }
   0x5   :  { %12 = vsyncpa [#allocation3], 0 }
   0x6   :  { %14 = vsyncpa [#allocation3 + $0x1], 0 }
   0x7   :  { %15 = vsyncpa [#allocation6], 0 }
   0x8   :  { %17 = vsyncpa [#allocation6 + $0x1], 0 }
   0x9   :  { %18 = vsyncpa [#allocation9], 0 }
   0xa   :  { %20 = vsyncpa [#allocation9 + $0x1], 0 }
   0xb   :  { %21 = vsyncpa [#allocation4], 0 }
   0xc   :  { %23 = vsyncpa [#allocation4 + $0x1], 0 }
   0xd   :  { %24 = vsyncpa [#allocation12], 0 }
   0xe   :  { %26 = vsyncpa [#allocation12 + $0x1], 0  ;;  %s1558_s21 = smov 0   ;;  %s1560_s22 = smov 0  }
   0xf   :  { %s1562_s23 = smov 0   ;;  %s1564_s24 = smov 0  }
  0x10   :  { %s1566_s25 = smov 0   ;;  %s1568_s26 = smov 0  }
  0x11   :  { %s1570_s27 = smov 0   ;;  %s1572_s28 = smov 0  }
  0x12   :  { %s1574_s29 = smov 0   ;;  %s1576_s30 = smov 0  }
  0x13   :  { %s1578_s7 = smov 0   ;;  %s1580_s8 = smov 0  }
  0x14   :  { %s1582_s9 = smov 0   ;;  %s1584_s10 = smov 0  }
  0x15 LB: > { %2024 = sst [smem:[#allocation19_spill]] %s1458_s21  ;;  %p68_p0 = scmp.eq.s32.totalorder %s1510_s10, 0  ;;  %s1510_s10 = sphi %s1584_s10, %s32_s10   ;;  %s1506_s9 = sphi %s1582_s9, %s2088_s9   ;;  %s1502_s8 = sphi %s1580_s8, %s2080_s8   ;;  %s1498_s7 = sphi %s1578_s7, %s2079_s7   ;;  %s1494_s30 = sphi %s1576_s30, %s2078_s30   ;;  %s1490_s29 = sphi %s1574_s29, %s2077_s29   ;;  %s1486_s28 = sphi %s1572_s28, %s2087_s28   ;;  %s1482_s27 = sphi %s1570_s27, %s2086_s27   ;;  %s1478_s26 = sphi %s1568_s26, %s2085_s26   ;;  %s1474_s25 = sphi %s1566_s25, %s2084_s25   ;;  %s1470_s24 = sphi %s1564_s24, %s2083_s24   ;;  %s1466_s23 = sphi %s1562_s23, %s2074_s23   ;;  %s1462_s22 = sphi %s1560_s22, %s2073_s22   ;;  %s1458_s21 = sphi %s1558_s21, %s2072_s21  }
  0x16   : > { %2025 = sst [smem:[#allocation20_spill]] %s1462_s22  ;;  %p93_p1 = scmp.ne.s32.totalorder %s1478_s26, %s1474_s25 }
  0x17   : > { %2026 = sst [smem:[#allocation21_spill]] %s1466_s23  ;;  %p1072_p2 = scmp.lt.s32.totalorder %s1510_s10, 4 }
  0x18   : > { %2027 = sst [smem:[#allocation22_spill]] %s1490_s29  ;;  %p95_p3 = por %p93_p1, %p68_p0 }
  0x19   : > { %2028 = sst [smem:[#allocation23_spill]] %s1494_s30  ;;  %s284_s13 = sand.u32 1, %s1510_s10  }
  0x1a   : > { %2029 = sst [smem:[#allocation24_spill]] %s1498_s7  ;;  %s1996_s14 = sand.u32 1, %s1478_s26  }
  0x1b   : > { %2030 = sst [smem:[#allocation25_spill]] %s1502_s8  ;;  %s1640_s15 = sshll.u32 %s1996_s14, 4 }
  0x1c   : > { %2031 = sst [smem:[#allocation26_spill]] %s1506_s9  ;;  %s1643_s16 = sshll.u32 %s1502_s8, 8 }
  0x1d   : > { %s2032_s1 = sld [smem:[#allocation34_spill]]  ;;  %s288_s20 = scalar_lea.vmem [#allocation5], %s1640_s15 }
  0x1e   : > { %s295_s11 = sshll.u32 %s288_s20, 4  ;;  %p1652_p4 = pnand %p1072_p2, %p95_p3  ;;  %s296_s11 = int_to_ptr.vmem [resolvable:$true] %s295_s11 }
  0x1f   : > { %s1656_s14 = scalar_lea.sflag [#allocation6], %s284_s13  ;;  %s1203_s6 = scalar_lea.vmem %s296_s11, 256 }
  0x20   : > { %p2006_p5 = pneg %p1652_p4  ;;  %p1204_p6 = scmp.ne.s32.totalorder %s296_s11, %s1203_s6 }
  0x21   : > { %s1512_s17 = smov [#allocation5]  }
  0x22   : > { %p1206_p7 = pnand %p1204_p6, %p2006_p5  ;;  %s1208_s18 = sshll.u32 %s1512_s17, 4  ;;  %s1209_s18 = int_to_ptr.vmem [resolvable:$false] %s1208_s18 }
  0x23   : > { %s294_s19 = scalar_lea.hbm %s2032_s1, %s1643_s16  ;;  %s1210_s20 = scalar_lea.vmem %s1209_s18, 512 }
  0x24   : > { %p1207_p8 = pneg %p1206_p7  ;;  %p1211_p9 = scmp.lt.s32.totalorder %s296_s11, %s1209_s18 }
  0x25   : > { %p1212_p10 = scmp.lt.s32.totalorder %s1210_s20, %s1203_s6 }
  0x27   : > { %p1213_p11 = por %p1212_p10, %p1211_p9 }
  0x29   : > { %p1214_p12 = pnand %p1213_p11, %p1207_p8 }
  0x2b   : > { %1217 = shalt.err (!%p1214_p12)
}
  0x2c   : > { %s2000_s1 = smov 128   ;;  %s2002_s6 = smov 8  }
  0x2d   : > { %1055 = dma.hbm_to_vmem [thread:$0]  (!%p1652_p4), %s294_s19, 256, %s296_s11, %s1656_s14, %s2000_s1, %s2000_s1, %s2002_s6  }
  0x2e   : > { %p974_p13 = scmp.ge.s32.totalorder %s1510_s10, 1  ;;  %p345_p1 = scmp.lt.s32.totalorder %s1510_s10, 5 }
  0x2f   : > { %s1676_s17 = sadd.s32 4294967295, %s1510_s10   ;;  %s2035_s20 = sadd.s32 1, %s1502_s8 }
  0x30   : > { %p1671_p3 = pnand %p974_p13, %p345_p1  ;;  %p45_p6 = scmp.ge.s32.totalorder %s2035_s20, 2 }
  0x31   : > { %s51_s4 = sadd.s32 1, %s1506_s9  ;;  %s60_s5 = sadd.s32 1, %s1490_s29 }
  0x32   : > { %s2036_s30 = smov %s2035_s20  ;;  %s2092_s4 = smov (!%p45_p6, %s51_s4), %s1506_s9 }
  0x33   : > { %s2090_s30 = smov (%p45_p6, %s2036_s30), 0  ;;  %p67_p7 = scmp.ne.s32.totalorder %s1490_s29, %s1486_s28 }
  0x34   : > { %2037 = sst [smem:[#allocation27_spill]] %s2090_s30  ;;  %p73_p8 = scmp.ne.s32.totalorder %s1486_s28, %s1482_s27 }
  0x35   : > { %p53_p9 = scmp.ge.s32.totalorder %s2092_s4, 2  ;;  %p74_p10 = scmp.eq.s32.totalorder %s1676_s17, 0 }
  0x36   : > { %p1695_p11 = por %p68_p0, %p67_p7  ;;  %s83_s19 = ssub.s32 %s1502_s8, %s2090_s30 }
  0x37   : > { %s2094_s4 = smov (%p53_p9, %s2092_s4), 0  ;;  %p1703_p12 = por %p74_p10, %p73_p8 }
  0x38   : > { %2039 = sst [smem:[#allocation28_spill]] %s2094_s4  ;;  %p84_p13 = scmp.eq.s32.totalorder %s83_s19, 0 }
  0x39   : > { %s2040_s27 = scalar_select %p1703_p12, 1, 0 }
  0x3a   : > { %s55_s20 = ssub.s32 %s1506_s9, %s2094_s4  ;;  %p99_p1 = scmp.ne.s32.totalorder %s1474_s25, %s1470_s24 }
  0x3b   : > { %p58_p0 = scmp.eq.s32.totalorder %s55_s20, 0  ;;  %s163_s1 = sor.u32 %s83_s19, %s55_s20 }
  0x3c   : > { %s2041_s6 = sadd.s32 1, %s1478_s26  ;;  %p1719_p6 = por %p99_p1, %p74_p10 }
  0x3d   : > { %s1714_s18 = scalar_select %p84_p13, %s1478_s26, %s2041_s6  }
  0x3e   : > { %s1717_s30 = scalar_select %p58_p0, %s1490_s29, %s60_s5  }
  0x3f   : > { %2042 = sst [smem:[#allocation29_spill]] %s1714_s18  ;;  %p166_p7 = scmp.eq.s32.totalorder %s163_s1, 0 }
  0x40   : > { %2043 = sst [smem:[#allocation30_spill]] %s1717_s30  ;;  %s168_s7 = sadd.s32 1, %s1466_s23 }
  0x41   : > { %s2044_s8 = scalar_select %p1719_p6, 1, 0 }
  0x42   : > { %p178_p8 = scmp.ne.s32.totalorder %s1466_s23, %s1462_s22  ;;  %p179_p9 = scmp.eq.s32.totalorder %s1676_s17, 3 }
  0x43   : > { %s1727_s24 = scalar_select %p166_p7, %s1466_s23, %s168_s7  }
  0x44   : > { %p184_p5 = scmp.ne.s32.totalorder %s1462_s22, %s1458_s21  ;;  %s2046_s19 = sadd.s32 4294967294, %s1510_s10  }
  0x45   : > { %2045 = sst [smem:[#allocation31_spill]] %s1727_s24  ;;  %p185_p13 = scmp.eq.s32.totalorder %s2046_s19, 3 }
  0x46   : > { %s265_s6 = sand.u32 1, %s1490_s29   ;;  %p1735_p0 = por %p179_p9, %p178_p8 }
  0x47   : > { %p1739_p10 = por %p185_p13, %p184_p5  ;;  %s963_s1 = sshll.u32 %s265_s6, 3 }
  0x48   : > { %s2047_s5 = scalar_select %p1735_p0, 1, 0 }
  0x49   : > { %s2049_s20 = scalar_select %p1739_p10, 1, 0 }
  0x4a   : > { %2048 = sst [smem:[#allocation32_spill]] %s2047_s5  ;;  %s964_s4 = sshll.u32 %s1506_s9, 7 }
  0x4b   : > { %2050 = sst [smem:[#allocation33_spill]] %s2049_s20  ;;  %s275_s7 = scalar_lea.hbm %s1989_s0, %s964_s4 }
  0x4c   : > { %s269_s24 = scalar_lea.vmem [#allocation2], %s963_s1  ;;  %p1751_p1 = pnand %p1072_p2, %p1695_p11 }
  0x4d   : > { %s277_s23 = sshll.u32 %s269_s24, 4  ;;  %s315_s20 = scalar_lea.hbm %s1991_s2, %s1643_s16  ;;  %s278_s23 = int_to_ptr.vmem [resolvable:$true] %s277_s23 }
  0x4e   : > { %s309_s5 = scalar_lea.vmem [#allocation7], %s1640_s15  ;;  %s266_s22 = scalar_lea.sflag [#allocation3], %s265_s6 }
  0x4f   : > { %s316_s9 = sshll.u32 %s309_s5, 4  ;;  %p1220_p5 = pneg %p1751_p1  ;;  %s317_s9 = int_to_ptr.vmem [resolvable:$true] %s316_s9 }
  0x50   : > { %s1231_s4 = scalar_lea.vmem %s278_s23, 128  ;;  %s1515_s30 = smov [#allocation2]  }
  0x51   : > { %p1232_p7 = scmp.ne.s32.totalorder %s278_s23, %s1231_s4  ;;  %s1236_s18 = sshll.u32 %s1515_s30, 4  ;;  %s1237_s18 = int_to_ptr.vmem [resolvable:$false] %s1236_s18 }
  0x52   : > { %s1238_s11 = scalar_lea.vmem %s1237_s18, 256  ;;  %p1239_p2 = scmp.lt.s32.totalorder %s278_s23, %s1237_s18 }
  0x53   : > { %p1234_p8 = pnand %p1232_p7, %p1220_p5  ;;  %p1240_p11 = scmp.lt.s32.totalorder %s1238_s11, %s1231_s4 }
  0x55   : > { %p1235_p9 = pneg %p1234_p8  ;;  %p1241_p13 = por %p1240_p11, %p1239_p2 }
  0x57   : > { %p1242_p10 = pnand %p1241_p13, %p1235_p9 }
  0x59   : > { %1245 = shalt.err (!%p1242_p10)
}
  0x5a   : > { %1052 = dma.hbm_to_vmem [thread:$0]  (!%p1751_p1), %s275_s7, 128, %s278_s23, %s266_s22  }
  0x5b   : > { %s1259_s21 = scalar_lea.vmem %s317_s9, 256  ;;  %p2052_p6 = pneg %p1652_p4 }
  0x5c   : > { %p1260_p0 = scmp.ne.s32.totalorder %s317_s9, %s1259_s21  ;;  %s1516_s29 = smov [#allocation7]  }
  0x5d   : > { %s1264_s24 = sshll.u32 %s1516_s29, 4  ;;  %s1265_s24 = int_to_ptr.vmem [resolvable:$false] %s1264_s24 }
  0x5e   : > { %p1262_p5 = pnand %p1260_p0, %p2052_p6  ;;  %s1266_s6 = scalar_lea.vmem %s1265_s24, 512 }
  0x5f   : > { %p1267_p8 = scmp.lt.s32.totalorder %s317_s9, %s1265_s24  ;;  %p1268_p12 = scmp.lt.s32.totalorder %s1266_s6, %s1259_s21 }
  0x60   : > { %p1263_p7 = pneg %p1262_p5 }
  0x61   : > { %p1269_p2 = por %p1268_p12, %p1267_p8 }
  0x63   : > { %p1270_p9 = pnand %p1269_p2, %p1263_p7 }
  0x65   : > { %1273 = shalt.err (!%p1270_p9)
}
  0x66   : > { %s2053_s5 = smov 8   ;;  %s2054_s22 = smov 128  }
  0x67   : > { %1058 = dma.hbm_to_vmem [thread:$0]  (!%p1652_p4), %s315_s20, 256, %s317_s9, %s1656_s14, %s2054_s22, %s2054_s22, %s2053_s5  }
  0x68   : > { %s336_s4 = scalar_lea.hbm %s1992_s3, %s1643_s16  ;;  %s330_s30 = scalar_lea.vmem [#allocation8], %s1640_s15 }
  0x69   : > { %s337_s18 = sshll.u32 %s330_s30, 4  ;;  %s2055_s11 = sand.u32 1, %s1478_s26   ;;  %s338_s18 = int_to_ptr.vmem [resolvable:$true] %s337_s18 }
  0x6a   : > { %s327_s21 = scalar_lea.sflag [#allocation9], %s2055_s11  ;;  %s1287_s29 = scalar_lea.vmem %s338_s18, 256 }
  0x6b   : > { %p1288_p12 = scmp.ne.s32.totalorder %s338_s18, %s1287_s29  ;;  %s1517_s24 = smov [#allocation8]  }
  0x6c   : > { %s1292_s6 = sshll.u32 %s1517_s24, 4  ;;  %s1293_s6 = int_to_ptr.vmem [resolvable:$false] %s1292_s6 }
  0x6d   : > { %p1290_p0 = pnand %p1288_p12, %p2052_p6  ;;  %s1294_s23 = scalar_lea.vmem %s1293_s6, 512 }
  0x6e   : > { %p1295_p1 = scmp.lt.s32.totalorder %s338_s18, %s1293_s6  ;;  %p1296_p11 = scmp.lt.s32.totalorder %s1294_s23, %s1287_s29 }
  0x6f   : > { %p1291_p10 = pneg %p1290_p0 }
  0x70   : > { %p1297_p13 = por %p1296_p11, %p1295_p1 }
  0x72   : > { %p1298_p5 = pnand %p1297_p13, %p1291_p10 }
  0x74   : > { %1301 = shalt.err (!%p1298_p5)
}
  0x75   : > { %1061 = dma.hbm_to_vmem [thread:$0]  (!%p1652_p4), %s336_s4, 256, %s338_s18, %s327_s21, %s2054_s22, %s2054_s22, %s2053_s5  }
  0x76   : > { %349 = sbr.rel (%p1671_p3) target bundleno = 394 (0x18a), region = 36  ;;  %s351_s9 = sand.u32 (!%p1671_p3), 1, %s1486_s28  }
  0x77   : > { %s1796_s14 = sshll.u32 (!%p1671_p3), %s351_s9, 3  ;;  %s352_s15 = scalar_lea.sflag (!%p1671_p3), [#allocation3], %s351_s9 }
  0x78   : > { %s355_s16 = scalar_lea.vmem (!%p1671_p3), [#allocation2], %s1796_s14  ;;  %p2056_p7 = scmp.ne.s32.totalorder (!%p1671_p3), %s2040_s27, 0 }
  0x7b   : > { %1437 = dma.done.wait (%p2056_p7), %s352_s15, 128  }
  0x7c   : > { %1439 = vsyncadd (%p2056_p7), %s352_s15, 4294967168  ;;  %s360_s12 = sand.u32 1, %s1676_s17   ;;  %s362_s13 = sand.u32 1, %s1474_s25  }
  0x7d   : > { %s1805_s20 = sshll.u32 %s362_s13, 4  ;;  %s361_s5 = scalar_lea.sflag [#allocation6], %s360_s12 }
  0x7e   : > { %s364_s22 = scalar_lea.vmem [#allocation5], %s1805_s20  ;;  %p2057_p4 = scmp.ne.s32.totalorder %s2044_s8, 0 }
  0x80   : > { %1441 = dma.done.wait (%p2057_p4), %s361_s5, 512  }
  0x81   : > { %1443 = vsyncadd (%p2057_p4), %s361_s5, 4294966784  ;;  %s373_s27 = scalar_lea.vmem [#allocation7], %s1805_s20  ;;  %s379_s1 = scalar_lea.sflag [#allocation9], %s362_s13 }
  0x82   : > { %s382_s7 = scalar_lea.vmem [#allocation8], %s1805_s20 }
  0x83   : > { %1445 = dma.done.wait (%p2057_p4), %s379_s1, 256  }
  0x84   : > { %1447 = vsyncadd (%p2057_p4), %s379_s1, 4294967040  ;;  %v1518_v0 = vmov 0.0   ;;  %vm1519_vm0 = vmmov 0   ;;  %vm439_vm1 = vcmask 261120   ;;  %v438_v1 = vld [vmem:[%s364_s22 + $0x8] sm:$0xff]  ;;  %v437_v3 = vld [vmem:[%s364_s22] sm:$0xff] }
  0x85   : > { %1014 = vmatprep.subr.mxu0 %v1518_v0  ;;  %1021 = vmatprep.subr.mxu1 %v1518_v0  ;;  %v522_v2 = vld [vmem:[%s373_s27 + $0x8] sm:$0xff]  ;;  %s2058_s8 = sld [smem:[#allocation20_spill]]  ;;  %v521_v4 = vld [vmem:[%s373_s27] sm:$0xff]  ;;  %vm519_vm2 = vcmask 130048  }
  0x86   : > { %1018 = vmatprep.mubr.msk.f32.mxu0 %vm1519_vm0, %v1518_v0  ;;  %1025 = vmatprep.mubr.msk.f32.mxu1 %vm1519_vm0, %v1518_v0  ;;  %s2059_s19 = sld [smem:[#allocation24_spill]]  ;;  %v436_v5 = vld [vmem:[%s355_s16] sm:$0xff]  ;;  %v600_v7 = vld [vmem:[%s382_s7] sm:$0xff] }
  0x87   : > { %1015 = vmatpush3.xpose.msk.msra.mxu0 %vm439_vm1, %v438_v1  ;;  %1022 = vmatpush3.xpose.msk.msra.mxu1 %vm439_vm1, %v522_v2  ;;  %s2060_s4 = sld [smem:[#allocation23_spill]]  ;;  %v601_v6 = vld [vmem:[%s382_s7 + $0x8] sm:$0xff] }
  0x88   : > { %1016 = vmatprep.subr.mxu0 %v1518_v0  ;;  %1023 = vmatprep.subr.mxu1 %v1518_v0  ;;  %s2061_s9 = sld [smem:[#allocation32_spill]] }
  0x89   : > { %s2062_s13 = sld [smem:[#allocation36_spill]] }
  0x8a   : > { %s2063_s27 = sld [smem:[#allocation35_spill]] }
  0x8b   : > { %1017 = vmatpush3.xpose.msk.msra.mxu0 %vm439_vm1, %v437_v3  ;;  %1024 = vmatpush3.xpose.msk.msra.mxu1 %vm439_vm1, %v521_v4  ;;  %s419_s30 = sand.u32 1, %s2058_s8  }
  0x8c   : > { %1028 = vmatprep.subr.mxu0 %v1518_v0  ;;  %s994_s18 = sshll.u32 %s2059_s19, 1  ;;  %s1838_s11 = sshll.u32 %s419_s30, 3 }
  0x8d   : > { %s702_s21 = sadd.s32 %s2060_s4, %s994_s18  ;;  %s428_s24 = scalar_lea.vmem [#allocation11], %s1838_s11 }
  0x8e   : > { %1019 = vmatmul.mubr.msk.f32.vlgmr.msra.gmra.mxu0 %vm439_vm1, %v436_v5  ;;  %1026 = vmatmul.mubr.msk.f32.vlgmr.msra.gmra.mxu1 %vm439_vm1, %v436_v5  ;;  %s1841_s29 = sshll.u32 %s702_s21, 7  ;;  %s722_s6 = sshll.u32 %s428_s24, 4  ;;  %s1851_s6 = int_to_ptr.vmem [resolvable:$true] %s722_s6 }
  0x8f   : > { %1029 = vmatpush3.xpose.msk.msra.mxu0 %vm439_vm1, %v601_v6  ;;  %1032 = vmatprep.mubr.msk.f32.mxu0 %vm1519_vm0, %v1518_v0  ;;  %s421_s23 = scalar_lea.vmem [#allocation10], %s1838_s11  ;;  %s1849_s20 = scalar_lea.hbm %s2062_s13, %s1841_s29 }
  0x90   : > { %1030 = vmatprep.subr.mxu0 %v1518_v0  ;;  %s706_s14 = sshll.u32 %s421_s23, 4  ;;  %s2064_s1 = smov %s2063_s27  ;;  %s1859_s14 = int_to_ptr.vmem [resolvable:$true] %s706_s14 }
  0x91   : > { %s1857_s7 = scalar_lea.hbm %s2063_s27, %s1841_s29  ;;  %s1865_s19 = scalar_lea.sflag [#allocation12], %s360_s12 }
  0x92   : > { %s1302_s4 = scalar_lea.vmem %s1851_s6, 128  ;;  %p2065_p8 = scmp.ne.s32.totalorder %s2061_s9, 0 }
  0x93   : > { %1031 = vmatpush3.xpose.msk.msra.mxu0 %vm439_vm1, %v600_v7  ;;  %p1303_p3 = scmp.ne.s32.totalorder %s1851_s6, %s1302_s4  ;;  %s1520_s18 = smov [#allocation11]  }
  0x94   : > { %s1306_s21 = sshll.u32 %s1520_s18, 4  ;;  %s1307_s21 = int_to_ptr.vmem [resolvable:$false] %s1306_s21 }
  0x95   : > { %p1304_p2 = pnand %p1303_p3, %p2065_p8  ;;  %s1308_s15 = scalar_lea.vmem %s1307_s21, 256 }
  0x96   : > { %1033 = vmatmul.mubr.msk.f32.vlgmr.msra.gmra.mxu0 %vm439_vm1, %v436_v5  ;;  %p1309_p12 = scmp.lt.s32.totalorder %s1851_s6, %s1307_s21  ;;  %p1310_p6 = scmp.lt.s32.totalorder %s1308_s15, %s1302_s4 }
  0x97   : > { %p1305_p9 = pneg %p1304_p2 }
  0x98   : > { %p1311_p0 = por %p1310_p6, %p1309_p12 }
  0x9a   : > { %p1312_p10 = pnand %p1311_p0, %p1305_p9 }
 0x14e   : > { %v515_v8 = vpop.f32.mrf.mxu0  ;;  %v595_v9 = vpop.f32.mrf.mxu1 }
 0x14f   : > { %520 = vst.msk [vmem:[%s421_s23] sm:$0xff] %vm519_vm2, %v515_v8  ;;  %599 = vst.msk [vmem:[%s428_s24] sm:$0xff] %vm519_vm2, %v595_v9 }
 0x150   : > { %v1020_v10 = vpop.f32.mrf.mxu0  ;;  %v1027_v11 = vpop.f32.mrf.mxu1 }
 0x151   : > { %1315 = shalt.err (!%p1312_p10)
}
 0x152   : > { %s1316_s17 = scalar_lea.hbm %s1849_s20, 128  ;;  %s1320_s23 = scalar_lea.hbm %s2062_s13, 512 }
 0x153   : > { %p1317_p1 = scmp.ne.s32.totalorder %s1849_s20, %s1316_s17  ;;  %p1321_p5 = scmp.lt.s32.totalorder %s1849_s20, %s2062_s13 }
 0x154   : > { %p1322_p7 = scmp.lt.s32.totalorder %s1320_s23, %s1316_s17 }
 0x155   : > { %p1318_p11 = pnand %p1317_p1, %p2065_p8 }
 0x156   : > { %p1323_p4 = por %p1322_p7, %p1321_p5 }
 0x157   : > { %p1319_p13 = pneg %p1318_p11 }
 0x159   : > { %p1324_p3 = pnand %p1323_p4, %p1319_p13 }
 0x15b   : > { %1327 = shalt.err (!%p1324_p3)
}
 0x15c   : > { %1044 = dma.vmem_to_hbm [thread:$0]  (%p2065_p8), %s1851_s6, 128, %s1849_s20, %s1865_s19  }
 0x15d   : > { %s680_s22 = scalar_lea.sflag [#allocation4], %s419_s30  ;;  %s1328_s27 = scalar_lea.vmem %s1859_s14, 128 }
 0x15e   : > { %p1329_p2 = scmp.ne.s32.totalorder %s1859_s14, %s1328_s27  ;;  %s1521_s4 = smov [#allocation10]  }
 0x15f   : > { %s1332_s18 = sshll.u32 %s1521_s4, 4  ;;  %s1333_s18 = int_to_ptr.vmem [resolvable:$false] %s1332_s18 }
 0x160   : > { %p1330_p9 = pnand %p1329_p2, %p2065_p8  ;;  %s1334_s21 = scalar_lea.vmem %s1333_s18, 256 }
 0x161   : > { %p1335_p6 = scmp.lt.s32.totalorder %s1859_s14, %s1333_s18  ;;  %p1336_p0 = scmp.lt.s32.totalorder %s1334_s21, %s1328_s27 }
 0x162   : > { %p1331_p12 = pneg %p1330_p9 }
 0x163   : > { %p1337_p10 = por %p1336_p0, %p1335_p6 }
 0x165   : > { %p1338_p1 = pnand %p1337_p10, %p1331_p12 }
 0x167   : > { %1341 = shalt.err (!%p1338_p1)
}
 0x168   : > { %s1342_s8 = scalar_lea.hbm %s1857_s7, 128  ;;  %s1346_s20 = scalar_lea.hbm %s2064_s1, 512 }
 0x169   : > { %p1343_p11 = scmp.ne.s32.totalorder %s1857_s7, %s1342_s8  ;;  %p1347_p7 = scmp.lt.s32.totalorder %s1857_s7, %s2064_s1 }
 0x16a   : > { %p1348_p4 = scmp.lt.s32.totalorder %s1346_s20, %s1342_s8 }
 0x16b   : > { %p1344_p13 = pnand %p1343_p11, %p2065_p8 }
 0x16c   : > { %p1349_p3 = por %p1348_p4, %p1347_p7 }
 0x16d   : > { %p1345_p5 = pneg %p1344_p13 }
 0x16f   : > { %p1350_p2 = pnand %p1349_p3, %p1345_p5 }
 0x171   : > { %1353 = shalt.err (!%p1350_p2)
}
 0x172   : > { %1043 = dma.vmem_to_hbm [thread:$0]  (%p2065_p8), %s1859_s14, 128, %s1857_s7, %s680_s22   ;;  %v674_v12 = vpop.f32.mrf.mxu0 }
 0x173   : > { %s435_s12 = scalar_lea.vmem [#allocation13], %s1838_s11  ;;  %s2066_s5 = sld [smem:[#allocation37_spill]] }
 0x174   : > { %s738_s24 = sshll.u32 %s435_s12, 4  ;;  %678 = vst.msk [vmem:[%s435_s12] sm:$0xff] %vm519_vm2, %v674_v12  ;;  %v1034_v13 = vpop.f32.mrf.mxu0  ;;  %s1522_s18 = smov [#allocation13]   ;;  %s739_s24 = int_to_ptr.vmem [resolvable:$true] %s738_s24 }
 0x175   : > { %s1354_s4 = scalar_lea.vmem %s739_s24, 128  ;;  %s1358_s21 = sshll.u32 %s1522_s18, 4  ;;  %s1359_s21 = int_to_ptr.vmem [resolvable:$false] %s1358_s21 }
 0x176   : > { %p1355_p9 = scmp.ne.s32.totalorder %s739_s24, %s1354_s4  ;;  %s1360_s11 = scalar_lea.vmem %s1359_s21, 256 }
 0x177   : > { %p1361_p0 = scmp.lt.s32.totalorder %s739_s24, %s1359_s21  ;;  %p1362_p10 = scmp.lt.s32.totalorder %s1360_s11, %s1354_s4 }
 0x178   : > { %p1356_p12 = pnand %p1355_p9, %p2065_p8 }
 0x179   : > { %s1915_s27 = scalar_lea.hbm %s2066_s5, %s1841_s29  ;;  %p1363_p1 = por %p1362_p10, %p1361_p0 }
 0x17a   : > { %p1357_p6 = pneg %p1356_p12 }
 0x17c   : > { %p1364_p11 = pnand %p1363_p1, %p1357_p6 }
 0x17e   : > { %1367 = shalt.err (!%p1364_p11)
}
 0x17f   : > { %s1368_s29 = scalar_lea.hbm %s1915_s27, 128  ;;  %s1372_s22 = scalar_lea.hbm %s2066_s5, 512 }
 0x180   : > { %p1369_p13 = scmp.ne.s32.totalorder %s1915_s27, %s1368_s29  ;;  %p1373_p4 = scmp.lt.s32.totalorder %s1915_s27, %s2066_s5 }
 0x181   : > { %p1374_p3 = scmp.lt.s32.totalorder %s1372_s22, %s1368_s29 }
 0x182   : > { %p1370_p5 = pnand %p1369_p13, %p2065_p8 }
 0x183   : > { %p1375_p2 = por %p1374_p3, %p1373_p4 }
 0x184   : > { %p1371_p7 = pneg %p1370_p5 }
 0x186   : > { %p1376_p9 = pnand %p1375_p2, %p1371_p7 }
 0x188   : > { %1379 = shalt.err (!%p1376_p9)
}
 0x189   : > { %1045 = dma.vmem_to_hbm [thread:$0]  (%p2065_p8), %s739_s24, 128, %s1915_s27, %s1865_s19  }
 0x18a PF: > { %s2067_s6 = sld [smem:[#allocation19_spill]]  ;;  %p1073_p12 = scmp.ge.s32.totalorder %s1510_s10, 2 }
 0x18b   : > { %s2068_s20 = sld [smem:[#allocation33_spill]] }
 0x190   : > { %s750_s15 = sand.u32 1, %s2067_s6  }
 0x191   : > { %p2069_p6 = scmp.ne.s32.totalorder %s2068_s20, 0  ;;  %s751_s17 = scalar_lea.sflag [#allocation4], %s750_s15 }
 0x193   : > { %p1063_p0 = pnand %p1073_p12, %p2069_p6 }
 0x195   : > { %p1064_p10 = pneg %p1063_p0 }
 0x197   : > { %1449 = dma.done.wait (%p1064_p10), %s751_s17, 128  }
 0x198   : > { %1451 = vsyncadd (%p1064_p10), %s751_s17, 4294967168  ;;  %s2070_s12 = sadd.s32 4294967294, %s1510_s10  }
 0x199   : > { %s759_s23 = sand.u32 1, %s2070_s12  }
 0x19a   : > { %s760_s16 = scalar_lea.sflag [#allocation12], %s759_s23 }
 0x19b   : > { %1453 = dma.done.wait (%p1064_p10), %s760_s16, 256  }
 0x19c   : > { %1455 = vsyncadd (%p1064_p10), %s760_s16, 4294967040  ;;  %s32_s10 = sadd.s32 1, %s1510_s10   ;;  %s2072_s21 = sld [smem:[#allocation20_spill]] }
 0x19d   : > { %p1942_p8 = scmp.ge.s32.totalorder %s32_s10, 6   ;;  %s2073_s22 = sld [smem:[#allocation21_spill]] }
 0x19e   : > { %s2074_s23 = sld [smem:[#allocation31_spill]]  ;;  %s2083_s24 = smov %s1474_s25 }
 0x19f   : > { %s2075_s19 = sld [smem:[#allocation29_spill]]  ;;  %s2084_s25 = smov %s1478_s26 }
 0x1a0   : > { %s2076_s4 = sld [smem:[#allocation22_spill]]  ;;  %s2086_s27 = smov %s1486_s28 }
 0x1a1   : > { %s2077_s29 = sld [smem:[#allocation30_spill]] }
 0x1a2   : > { %s2078_s30 = sld [smem:[#allocation25_spill]] }
 0x1a3   : > { %s2079_s7 = sld [smem:[#allocation26_spill]] }
 0x1a4   : > { %s2080_s8 = sld [smem:[#allocation27_spill]] }
 0x1a5   : > { %s2081_s18 = sld [smem:[#allocation28_spill]]  ;;  %s2085_s26 = smov %s2075_s19 }
 0x1a6   : > { %s2087_s28 = smov %s2076_s4 }
 0x1a7   :  { %31 = sbr.rel (!%p1942_p8) target bundleno = 21 (0x15), region = 150 }
 0x1ab   : > { %s2088_s9 = smov %s2081_s18 }
 0x1ac   :  { %774 = vsyncpa [#allocation3], 1 }
 0x1ad   :  { %776 = vsyncpa [#allocation3 + $0x1], 1 }
 0x1ae   :  { %777 = vsyncpa [#allocation6], 1 }
 0x1af   :  { %779 = vsyncpa [#allocation6 + $0x1], 1 }
 0x1b0   :  { %780 = vsyncpa [#allocation9], 1 }
 0x1b1   :  { %782 = vsyncpa [#allocation9 + $0x1], 1 }
 0x1b2   :  { %783 = vsyncpa [#allocation4], 1 }
 0x1b3   :  { %785 = vsyncpa [#allocation4 + $0x1], 1 }
 0x1b4   :  { %786 = vsyncpa [#allocation12], 1 }
 0x1b5   :  { %788 = vsyncpa [#allocation12 + $0x1], 1 }

</bundles_post_ra>
